<compile_context>
chip_gen: v7x
topology: tpu7x:2x2x1
jax: 0.10.0
libtpu: 0.0.40
codegen_flags: <defaults>
</compile_context>

<pallas_src>
import functools

import jax
import jax.numpy as jnp
from jax.experimental import pallas as pl
from jax.experimental.pallas import tpu as pltpu

_LANES = 128


def _hinge_loss_kernel(a_ref, b_ref, o_ref, acc_ref, *, margin, n_rows, block_rows):
    pid = pl.program_id(0)

    @pl.when(pid == 0)
    def _init():
        acc_ref[...] = jnp.zeros_like(acc_ref)

    a = a_ref[...]                                   # (block_rows, 128) f32, lane-dense
    b = b_ref[...]

    # sigmoid(a) - sigmoid(b) == 0.5 * (tanh(a/2) - tanh(b/2))  -> 1 EUP op / element.
    diff = jnp.float32(0.5) * (
        jnp.tanh(a * jnp.float32(0.5)) - jnp.tanh(b * jnp.float32(0.5))
    )
    # hinge_embedding_loss with target == -1 everywhere: max(0, margin - diff)
    per_elem = jnp.maximum(jnp.float32(0.0), jnp.float32(margin) - diff)

    # Mask out padded elements (flat index >= n_rows) so they contribute 0.
    base = pid * (block_rows * _LANES)
    row = jax.lax.broadcasted_iota(jnp.int32, (block_rows, _LANES), 0)
    lane = jax.lax.broadcasted_iota(jnp.int32, (block_rows, _LANES), 1)
    flat_idx = base + row * _LANES + lane
    per_elem = jnp.where(flat_idx < n_rows, per_elem, jnp.float32(0.0))

    acc_ref[...] += jnp.sum(per_elem)                # f32 running sum, (1,1)

    @pl.when(pid == pl.num_programs(0) - 1)
    def _finish():
        o_ref[...] = acc_ref[...] * jnp.float32(1.0 / n_rows)


def flow_softmax_ce_loss(local_batch, margin, positive=False):
    """Pallas implementation of FlowSoftmaxCELoss.forward.

    Args:
      local_batch: (N, C) float array of logits, C >= 2.
      margin: python float, the hinge margin.
      positive: python bool, same meaning as the torch module.

    Returns:
      scalar float32 loss.
    """
    local_batch = jnp.asarray(local_batch, jnp.float32)
    n, _ = local_batch.shape

    # Only columns 0 and 1 are ever used — slice them out before the kernel so
    # we DMA exactly 2*N f32 from HBM, not N*C.
    if positive:
        a = local_batch[:, 1]
        b = local_batch[:, 0]
    else:
        a = local_batch[:, 0]
        b = local_batch[:, 1]

    # Lane-dense repack: (N,) -> (rows_pad, 128), padded with zeros (masked in-kernel).
    rows = -(-n // _LANES)
    block_rows = min(512, ((rows + 7) // 8) * 8)     # multiple of 8 sublanes, <= 512
    rows_pad = -(-rows // block_rows) * block_rows
    n_pad = rows_pad * _LANES
    num_tiles = rows_pad // block_rows

    pad = n_pad - n
    a2 = jnp.pad(a, (0, pad)).reshape(rows_pad, _LANES)
    b2 = jnp.pad(b, (0, pad)).reshape(rows_pad, _LANES)

    kernel = functools.partial(
        _hinge_loss_kernel,
        margin=float(margin),
        n_rows=n,
        block_rows=block_rows,
    )

    out = pl.pallas_call(
        kernel,
        out_shape=jax.ShapeDtypeStruct((1, 1), jnp.float32),
        grid_spec=pltpu.PrefetchScalarGridSpec(
            num_scalar_prefetch=0,
            grid=(num_tiles,),
            in_specs=[
                pl.BlockSpec((block_rows, _LANES), lambda i: (i, 0)),
                pl.BlockSpec((block_rows, _LANES), lambda i: (i, 0)),
            ],
            out_specs=pl.BlockSpec((1, 1), lambda i: (0, 0)),
            scratch_shapes=[pltpu.VMEM((1, 1), jnp.float32)],
        ),
        compiler_params=pltpu.CompilerParams(
            dimension_semantics=("arbitrary",),
        ),
    )(a2, b2)
    return out[0, 0]


def _reference(local_batch, margin, positive=False):
    s = jax.nn.sigmoid(local_batch.astype(jnp.float32))
    diff = (s[:, 1] - s[:, 0]) if positive else (s[:, 0] - s[:, 1])
    return jnp.mean(jnp.maximum(0.0, margin - diff))


if __name__ == "__main__":
    key = jax.random.PRNGKey(0)
    N, C = 8, 2           # small batch of 2-class logits, as the forward implies
    margin = 0.5
    local_batch = jax.random.normal(key, (N, C), dtype=jnp.float32)

    loss_neg = flow_softmax_ce_loss(local_batch, margin, positive=False)
    loss_pos = flow_softmax_ce_loss(local_batch, margin, positive=True)

    # Larger, non-multiple-of-128 batch with extra columns: exercises the tiled,
    # masked, column-sliced path.
    big = jax.random.normal(jax.random.PRNGKey(1), (1000, 4), dtype=jnp.float32)
    loss_big = flow_softmax_ce_loss(big, margin, positive=False)

    jax.block_until_ready((loss_neg, loss_pos, loss_big))

    ref_neg = _reference(local_batch, margin, positive=False)
    ref_pos = _reference(local_batch, margin, positive=True)
    ref_big = _reference(big, margin, positive=False)

    assert jnp.allclose(loss_neg, ref_neg, atol=1e-5), (loss_neg, ref_neg)
    assert jnp.allclose(loss_pos, ref_pos, atol=1e-5), (loss_pos, ref_pos)
    assert jnp.allclose(loss_big, ref_big, atol=1e-5), (loss_big, ref_big)

    print("KERNEL_OK")
</pallas_src>

<mosaic_0001>
module attributes {stable_mosaic.version = 11 : i64} {
  func.func @_hinge_loss_kernel(%arg0: i32, %arg1: memref<8x128xf32, #tpu.memory_space<vmem>>, %arg2: memref<8x128xf32, #tpu.memory_space<vmem>>, %arg3: memref<1x1xf32, #tpu.memory_space<vmem>>, %arg4: memref<1x1xf32, #tpu.memory_space<vmem>>) attributes {dimension_semantics = [#tpu.dimension_semantics<arbitrary>], iteration_bounds = array<i64: 1>, scalar_prefetch = 0 : i64, scratch_operands = 1 : i64, tpu.core_type = #tpu.core_type<tc>, window_params = [{transform_indices = @transform_0, window_bounds = array<i64: 8, 128>}, {transform_indices = @transform_1, window_bounds = array<i64: 8, 128>}, {pipeline_mode = #tpu.pipeline_mode<synchronous>, transform_indices = @transform_2, window_bounds = array<i64: 1, 1>}]} {
    %c0_i32 = arith.constant 0 : i32
    %0 = arith.cmpi eq, %arg0, %c0_i32 : i32
    %1 = arith.extui %0 : i1 to i32
    %c0_i32_0 = arith.constant 0 : i32
    %2 = arith.cmpi ne, %1, %c0_i32_0 : i32
    scf.if %2 {
      %cst_16 = arith.constant 0.000000e+00 : f32
      %41 = vector.broadcast %cst_16 : f32 to vector<1x1xf32>
      %c0_17 = arith.constant 0 : index
      %c0_18 = arith.constant 0 : index
      %42 = vector.load %arg4[%c0_17, %c0_18] : memref<1x1xf32, #tpu.memory_space<vmem>>, vector<1x1xf32>
      tpu.vector_store %arg4[%c0_17, %c0_18], %41 {strides = array<i32>} : memref<1x1xf32, #tpu.memory_space<vmem>>, vector<1x1xf32>,
    } else {
    }
    %c0 = arith.constant 0 : index
    %c0_1 = arith.constant 0 : index
    %3 = vector.load %arg1[%c0, %c0_1] : memref<8x128xf32, #tpu.memory_space<vmem>>, vector<8x128xf32>
    %c0_2 = arith.constant 0 : index
    %c0_3 = arith.constant 0 : index
    %4 = vector.load %arg2[%c0_2, %c0_3] : memref<8x128xf32, #tpu.memory_space<vmem>>, vector<8x128xf32>
    %cst = arith.constant 5.000000e-01 : f32
    %5 = vector.broadcast %cst : f32 to vector<8x128xf32>
    %6 = arith.mulf %3, %5 : vector<8x128xf32>
    %7 = math.tanh %6 : vector<8x128xf32>
    %cst_4 = arith.constant 5.000000e-01 : f32
    %8 = vector.broadcast %cst_4 : f32 to vector<8x128xf32>
    %9 = arith.mulf %4, %8 : vector<8x128xf32>
    %10 = math.tanh %9 : vector<8x128xf32>
    %11 = arith.subf %7, %10 : vector<8x128xf32>
    %cst_5 = arith.constant 5.000000e-01 : f32
    %12 = vector.broadcast %cst_5 : f32 to vector<8x128xf32>
    %13 = arith.mulf %12, %11 : vector<8x128xf32>
    %cst_6 = arith.constant 5.000000e-01 : f32
    %14 = vector.broadcast %cst_6 : f32 to vector<8x128xf32>
    %15 = arith.subf %14, %13 : vector<8x128xf32>
    %cst_7 = arith.constant 0.000000e+00 : f32
    %16 = vector.broadcast %cst_7 : f32 to vector<8x128xf32>
    %17 = arith.maximumf %16, %15 : vector<8x128xf32>
    %c1024_i32 = arith.constant 1024 : i32
    %18 = arith.muli %arg0, %c1024_i32 : i32
    %19 = tpu.iota {dimensions = array<i32: 0>} : vector<8x128xi32>
    %20 = tpu.iota {dimensions = array<i32: 1>} : vector<8x128xi32>
    %c128_i32 = arith.constant 128 : i32
    %21 = vector.broadcast %c128_i32 : i32 to vector<8x128xi32>
    %22 = arith.muli %19, %21 : vector<8x128xi32>
    %23 = vector.broadcast %18 : i32 to vector<8x128xi32>
    %24 = arith.addi %23, %22 : vector<8x128xi32>
    %25 = arith.addi %24, %20 : vector<8x128xi32>
    %c8_i32 = arith.constant 8 : i32
    %26 = vector.broadcast %c8_i32 : i32 to vector<8x128xi32>
    %27 = arith.cmpi slt, %25, %26 : vector<8x128xi32>
    %cst_8 = arith.constant 0.000000e+00 : f32
    %28 = vector.broadcast %cst_8 : f32 to vector<8x128xf32>
    %29 = arith.select %27, %17, %28 : vector<8x128xi1>, vector<8x128xf32>
    %c0_9 = arith.constant 0 : index
    %c0_10 = arith.constant 0 : index
    %30 = vector.load %arg4[%c0_9, %c0_10] : memref<1x1xf32, #tpu.memory_space<vmem>>, vector<1x1xf32>
    %31 = vector.shape_cast %29 : vector<8x128xf32> to vector<1x8x128xf32>
    %cst_11 = arith.constant dense<0.000000e+00> : vector<1xf32>
    %32 = vector.multi_reduction <add>, %31, %cst_11 [1, 2] : vector<1x8x128xf32> to vector<1xf32>
    %33 = vector.shape_cast %32 : vector<1xf32> to vector<1x1x1xf32>
    %34 = vector.extract %33[0, 0, 0] : f32 from vector<1x1x1xf32>
    %35 = vector.broadcast %34 : f32 to vector<1x1xf32>
    %36 = arith.addf %30, %35 : vector<1x1xf32>
    %c0_12 = arith.constant 0 : index
    %c0_13 = arith.constant 0 : index
    %37 = vector.load %arg4[%c0_12, %c0_13] : memref<1x1xf32, #tpu.memory_space<vmem>>, vector<1x1xf32>
    tpu.vector_store %arg4[%c0_12, %c0_13], %36 {strides = array<i32>} : memref<1x1xf32, #tpu.memory_space<vmem>>, vector<1x1xf32>,
    %c0_i32_14 = arith.constant 0 : i32
    %38 = arith.cmpi eq, %arg0, %c0_i32_14 : i32
    %39 = arith.extui %38 : i1 to i32
    %c0_i32_15 = arith.constant 0 : i32
    %40 = arith.cmpi ne, %39, %c0_i32_15 : i32
    scf.if %40 {
      %c0_16 = arith.constant 0 : index
      %c0_17 = arith.constant 0 : index
      %41 = vector.load %arg4[%c0_16, %c0_17] : memref<1x1xf32, #tpu.memory_space<vmem>>, vector<1x1xf32>
      %cst_18 = arith.constant 1.250000e-01 : f32
      %42 = vector.broadcast %cst_18 : f32 to vector<1x1xf32>
      %43 = arith.mulf %41, %42 : vector<1x1xf32>
      %c0_19 = arith.constant 0 : index
      %c0_20 = arith.constant 0 : index
      %44 = vector.load %arg3[%c0_19, %c0_20] : memref<1x1xf32, #tpu.memory_space<vmem>>, vector<1x1xf32>
      tpu.vector_store %arg3[%c0_19, %c0_20], %43 {strides = array<i32>} : memref<1x1xf32, #tpu.memory_space<vmem>>, vector<1x1xf32>,
    } else {
    }
    return
  }
  func.func @transform_0(%arg0: i32) -> (i32, i32) {
    %c0_i32 = arith.constant 0 : i32
    %c0_i32_0 = arith.constant 0 : i32
    return %arg0, %c0_i32 : i32, i32
  }
  func.func @transform_1(%arg0: i32) -> (i32, i32) {
    %c0_i32 = arith.constant 0 : i32
    %c0_i32_0 = arith.constant 0 : i32
    return %arg0, %c0_i32 : i32, i32
  }
  func.func @transform_2(%arg0: i32) -> (i32, i32) {
    %c0_i32 = arith.constant 0 : i32
    %c0_i32_0 = arith.constant 0 : i32
    %c0_i32_1 = arith.constant 0 : i32
    return %c0_i32, %c0_i32_0 : i32, i32
  }
}

</mosaic_0001>

<bundles_post_ra>
// kernel: tpu_custom_call.1
= control target key start
LH: loop header
LB: loop body
LE: loop exit
PB: predicated region body
PF: predicated region fallthrough
CT: control target
= control target key end

     0   :  { %7 = vsyncpa [#allocation4], 0  ;;  %s239_s0 = inlined_call_operand.hbm [shape: f32[8,128], index: 0, kind: input, shape index: {}]   ;;  %s240_s1 = inlined_call_operand.hbm [shape: f32[8,128], index: 1, kind: input, shape index: {}]   ;;  %s241_s2 = inlined_call_operand.hbm [shape: f32[1,1], index: 2, kind: output, shape index: {}]  }
   0x1   :  { %8 = vsyncpa [#allocation7], 0 }
   0x2   :  { %9 = vsyncpa [#allocation5], 0  ;;  %s181_s9 = smov [#allocation3]   ;;  %s182_s11 = smov [#allocation6]  }
   0x3   :  { %s16_s10 = sshll.u32 %s181_s9, 4  ;;  %s26_s12 = sshll.u32 %s182_s11, 4  ;;  %s17_s10 = int_to_ptr.vmem [resolvable:$true] %s16_s10  ;;  %s27_s12 = int_to_ptr.vmem [resolvable:$true] %s26_s12 }
   0x4   :  { %s109_s15 = scalar_lea.hbm %s239_s0, 128 }
   0x5   :  { %p110_p0 = scmp.ne.s32.totalorder %s239_s0, %s109_s15  ;;  %p113_p1 = scmp.lt.u32.totalorder %s109_s15, %s239_s0 }
   0x7   :  { %p115_p2 = pnand %p113_p1, %p110_p0 }
   0x9   :  { %118 = shalt.err (!%p115_p2)
}
   0xa   :  { %s119_s20 = scalar_lea.vmem %s17_s10, 128  ;;  %p124_p4 = scmp.lt.s32.totalorder %s17_s10, %s17_s10 }
   0xb   :  { %p120_p3 = scmp.ne.s32.totalorder %s17_s10, %s119_s20  ;;  %p125_p5 = scmp.lt.s32.totalorder %s119_s20, %s119_s20 }
   0xd   :  { %p126_p6 = por %p125_p5, %p124_p4 }
   0xf   :  { %p127_p7 = pnand %p126_p6, %p120_p3 }
  0x11   :  { %130 = shalt.err (!%p127_p7)
}
  0x12   :  { %19 = dma.hbm_to_vmem [thread:$0]  %s239_s0, 128, %s17_s10, [#allocation4]  }
  0x13   :  { %s131_s25 = scalar_lea.hbm %s240_s1, 128 }
  0x14   :  { %p132_p8 = scmp.ne.s32.totalorder %s240_s1, %s131_s25  ;;  %p135_p9 = scmp.lt.u32.totalorder %s131_s25, %s240_s1 }
  0x16   :  { %p137_p10 = pnand %p135_p9, %p132_p8 }
  0x18   :  { %140 = shalt.err (!%p137_p10)
}
  0x19   :  { %s141_s30 = scalar_lea.vmem %s27_s12, 128  ;;  %p146_p12 = scmp.lt.s32.totalorder %s27_s12, %s27_s12 }
  0x1a   :  { %p142_p11 = scmp.ne.s32.totalorder %s27_s12, %s141_s30  ;;  %p147_p13 = scmp.lt.s32.totalorder %s141_s30, %s141_s30 }
  0x1c   :  { %p148_p0 = por %p147_p13, %p146_p12 }
  0x1e   :  { %p149_p1 = pnand %p148_p0, %p142_p11 }
  0x20   :  { %152 = shalt.err (!%p149_p1)
}
  0x21   :  { %29 = dma.hbm_to_vmem [thread:$0]  %s240_s1, 128, %s27_s12, [#allocation7]  }
  0x22   :  { %175 = dma.done.wait [#allocation4], 128  }
  0x23   :  { %176 = vsyncadd [#allocation4], 4294967168 }
  0x24   :  { %177 = dma.done.wait [#allocation7], 128  }
  0x25   :  { %178 = vsyncadd [#allocation7], 4294967168  ;;  %v42_v0 = vld [vmem:[#allocation3] sm:$0xff]  ;;  %v43_v1 = vld [vmem:[#allocation6] sm:$0xff]  ;;  %v53_v4 = vlaneseq  ;;  %vm40_vm1 = vcmask 0   ;;  %v183_v16 = vmov 0.0  }
  0x26   :  { %v44_v2 = vmul.f32 0.5, %v42_v0  ;;  %v46_v3 = vmul.f32 0.5, %v43_v1  ;;  %41 = vst.msk [vmem:[#allocation2] sm:$0x1] %vm40_vm1, %v183_v16  ;;  %s184_s4 = smov [#allocation8]  }
  0x27   :  { %v54_v5 = vshrl.u32 %v53_v4, 7  ;;  %v56_v6 = vand.u32 127, %v53_v4  ;;  %s89_s5 = sshll.u32 %s184_s4, 4  ;;  %s90_s5 = int_to_ptr.vmem [resolvable:$true] %s89_s5 }
  0x28   :  { %105 = vtanh.f32 %v44_v2  ;;  %s153_s6 = scalar_lea.vmem %s90_s5, 16  ;;  %s157_s7 = scalar_lea.vmem %s90_s5, 32 }
  0x29   :  { %107 = vtanh.f32 %v46_v3  ;;  %v57_v7 = vmul.u32 128, %v54_v5  ;;  %p154_p2 = scmp.ne.s32.totalorder %s90_s5, %s153_s6  ;;  %p158_p3 = scmp.lt.s32.totalorder %s90_s5, %s90_s5 }
  0x2a   :  { %p159_p4 = scmp.lt.s32.totalorder %s157_s7, %s153_s6 }
  0x2b   :  { %v60_v11 = vadd.s32 %v57_v7, %v56_v6 }
  0x2c   :  { %p160_p5 = por %p159_p4, %p158_p3 }
  0x2d   :  { %vm61_vm0 = vcmp.lt.s32.totalorder %v60_v11, 8  ;;  %v63_v24 = vld [vmem:[#allocation2] sm:$0x1] }
  0x2e   :  { %p161_p6 = pnand %p160_p5, %p154_p2 }
  0x32   :  { %v106_v8 = vpop.eup %105 }
  0x33   :  { %v108_v9 = vpop.eup %107 }
  0x34   :  { %v48_v10 = vsub.f32 %v106_v8, %v108_v9 }
  0x36   :  { %v49_v12 = vmul.f32 0.5, %v48_v10 }
  0x38   :  { %v50_v13 = vsub.f32 0.5, %v49_v12 }
  0x3a   :  { %v51_v14 = vmax.f32 %v50_v13, 0.0 }
  0x3c   :  { %v62_v15 = vsel %vm61_vm0, %v51_v14, 0.0 }
  0x3d   :  { %64 = vadd.xlane.f32.xlu0 %v62_v15 }
  0xca   :  { %v65_v17 = vpop.xlane.xlu0 %64 }
  0xcb   :  { %v66_v18 = vrot.slane %v65_v17, 4 }
  0xcd   :  { %v67_v19 = vadd.f32 %v66_v18, %v65_v17 }
  0xcf   :  { %v68_v20 = vrot.slane %v67_v19, 2 }
  0xd1   :  { %v69_v21 = vadd.f32 %v68_v20, %v67_v19 }
  0xd3   :  { %v70_v22 = vrot.slane %v69_v21, 1 }
  0xd5   :  { %v71_v23 = vadd.f32 %v70_v22, %v69_v21 }
  0xd7   :  { %99 = vpush %v71_v23 }
 0x108   :  { %s100_s1 = spop %99 }
 0x109   :  { %v73_v25 = vstv %s100_s1 }
 0x10a   :  { %v74_v26 = vadd.f32 %v73_v25, %v63_v24 }
 0x10c   :  { %76 = vst.msk [vmem:[#allocation2] sm:$0x1] %vm40_vm1, %v74_v26 }
 0x113   :  { %v80_v27 = vld [vmem:[#allocation2] sm:$0x1] }
 0x114   :  { %v81_v28 = vmul.f32 0.125, %v80_v27 }
 0x116   :  { %82 = vst.msk [vmem:[#allocation8] sm:$0x1] %vm40_vm1, %v81_v28 }
 0x117   :  { %164 = shalt.err (!%p161_p6)
}
 0x118   :  { %s165_s10 = scalar_lea.hbm %s241_s2, 16 }
 0x119   :  { %p166_p7 = scmp.ne.s32.totalorder %s241_s2, %s165_s10  ;;  %p169_p8 = scmp.lt.u32.totalorder %s165_s10, %s241_s2 }
 0x11b   :  { %p171_p9 = pnand %p169_p8, %p166_p7 }
 0x11d   :  { %174 = shalt.err (!%p171_p9)
}
 0x11e   :  { %92 = dma.vmem_to_hbm [thread:$0]  %s90_s5, 16, %s241_s2, [#allocation5]  }
 0x11f   :  { %179 = dma.done.wait [#allocation5], 16  }
 0x120   :  { %180 = vsyncadd [#allocation5], 4294967280 }
 0x121   :  { %96 = vsyncpa [#allocation4], 1 }
 0x122   :  { %97 = vsyncpa [#allocation7], 1 }
 0x123   :  { %98 = vsyncpa [#allocation5], 1 }

</bundles_post_ra>
